<compile_context>
chip_gen: v5e
topology: v5e:2x2
jax: 0.10.0
libtpu: 0.0.40
codegen_flags: <defaults>
</compile_context>

<pallas_src>
import functools

import jax
import jax.numpy as jnp
from jax import lax
from jax.experimental import pallas as pl
from jax.experimental.pallas import tpu as pltpu


def _cdiv(a, b):
    return (a + b - 1) // b


def _round_up(x, m):
    return _cdiv(x, m) * m


def _vmem_capacity_bytes():
    """Per-core VMEM capacity; conservative 64 MiB (v7x) if the query fails."""
    try:
        cap = int(pltpu.get_tpu_info().vmem_capacity_bytes)
        if cap > 0:
            return cap
    except Exception:
        pass
    return 64 << 20


def _working_set_bytes(tm, tv, H, cb, ob):
    """Double-buffered VMEM working set for one grid step (bytes)."""
    return ((3 * tm * H            # features tile (x2) + h scratch (x1)
             + 2 * H * H           # dense weight (grid-invariant, 2-buffered)
             + 2 * H * tv) * cb    # decoder weight tile
            + 2 * tm * tv * ob     # output tile
            + 2 * (3 * H + tv) * 4)  # f32 biases / LN params


_TM_LADDER = (1024, 768, 512, 384, 256, 128, 64, 32, 16, 8)
_TV_LADDER = (2048, 1536, 1024, 768, 512, 256, 128)


def _select_tiles(M, H, V, cb, ob, vmem_budget, tm=None, tv=None):
    """Pick (tm, tv, M_pad, V_pad). tm: multiple of 8; tv: multiple of 128."""
    M8 = _round_up(max(M, 1), 8)
    V128 = _round_up(max(V, 1), 128)

    if tm is None or tv is None:
        found = None
        # Largest row tile first: it sets the arithmetic intensity of the
        # decoder matmul w.r.t. w_dec streaming.
        for tmc in _TM_LADDER:
            tmb = min(tmc, M8)
            for tvc in _TV_LADDER:
                tvb = min(tvc, V128)
                if _working_set_bytes(tmb, tvb, H, cb, ob) <= vmem_budget:
                    found = (tmb, tvb)
                    break
            if found is not None:
                break
        if found is None:
            found = (min(8, M8), min(128, V128))
        if tm is None:
            tm = found[0]
        if tv is None:
            tv = found[1]
    tm = min(_round_up(tm, 8), M8)
    tv = min(_round_up(tv, 128), V128)

    # Spread rows / vocab evenly over the grid so padding waste stays below
    # one granule per tile, then round back to hardware granules.
    gm = _cdiv(M8, tm)
    tm = _round_up(_cdiv(M8, gm), 8)
    gv = _cdiv(V128, tv)
    tv = _round_up(_cdiv(V128, gv), 128)

    # v7x megacore: the row axis is the "parallel" one; give both TensorCores
    # work when halving tm still keeps the decoder matmul compute-bound.
    if gm == 1 and M8 >= 1024:
        gm = 2
        tm = _round_up(_cdiv(M8, gm), 8)

    return tm, tv, tm * gm, tv * gv


def _lm_head_kernel(feat_ref, wd_ref, bd_ref, gamma_ref, beta_ref,
                    wdec_ref, bdec_ref, out_ref, h_scratch, *, eps):
    # grid = (M_pad // tm, V_pad // tv); axis 0 picks a row tile, axis 1 a
    # vocab tile.
    #
    # CORRECTNESS NOTE: the h_scratch caching below is only valid because the
    # vocab axis (axis 1) is the innermost, sequentially iterated ("arbitrary")
    # grid axis and each row tile is visited exactly once per core. Do not
    # reorder the grid or mark axis 1 "parallel" without removing this caching.
    j = pl.program_id(1)

    # Compute dense -> GELU -> LayerNorm once per row tile (at the first vocab
    # tile), cache it in VMEM scratch, reuse for every vocab tile. All
    # elementwise math stays in f32 (v5e has no bf16 VPU/EUP paths).
    @pl.when(j == 0)
    def _():
        x = jnp.dot(feat_ref[...], wd_ref[...],
                    preferred_element_type=jnp.float32) + bd_ref[...]
        # Exact GELU (nn.GELU default): 0.5 * x * (1 + erf(x / sqrt(2)))
        x = 0.5 * x * (1.0 + lax.erf(x * 0.7071067811865476))
        # LayerNorm over hidden dim (biased variance, like torch.nn.LayerNorm)
        mean = jnp.mean(x, axis=-1, keepdims=True)
        var = jnp.mean(jnp.square(x - mean), axis=-1, keepdims=True)
        xn = (x - mean) * lax.rsqrt(var + eps)
        h_scratch[...] = (xn * gamma_ref[...] + beta_ref[...]).astype(h_scratch.dtype)

    # Decoder projection for this (row tile, vocab tile). f32 accumulation.
    out_ref[...] = (jnp.dot(h_scratch[...], wdec_ref[...],
                            preferred_element_type=jnp.float32)
                    + bdec_ref[...]).astype(out_ref.dtype)


def lm_head(features, w_dense, b_dense, gamma, beta, w_dec, b_dec,
            *, eps=1e-5, tm=None, tv=None,
            compute_dtype=jnp.bfloat16, out_dtype=None):
    """RoBERTa LM head: decoder(LayerNorm(GELU(dense(features)))).

    features: [B, S, H]. w_dense: [H, H] and w_dec: [H, V] are pre-transposed
    to (in_features, out_features). For repeated calls, store the weights in
    `compute_dtype` (and ideally with V already a multiple of 128) so the
    casts / pads below are no-ops instead of extra HBM passes per call.
    """
    B, S, H = features.shape
    V = w_dec.shape[1]
    M = B * S

    cdt = jnp.dtype(compute_dtype)
    # Logits default to the compute dtype (bf16 on the fast path): the M*V
    # output write is mandatory HBM traffic and downstream softmax/xent
    # accumulates in f32 anyway. Pass out_dtype=jnp.float32 for f32 logits.
    odt = cdt if out_dtype is None else jnp.dtype(out_dtype)

    vmem_cap = _vmem_capacity_bytes()
    vmem_budget = int(vmem_cap * 0.85)
    tm, tv, M_pad, V_pad = _select_tiles(M, H, V, cdt.itemsize, odt.itemsize,
                                         vmem_budget, tm=tm, tv=tv)

    def _as(x, dt):
        return x if x.dtype == dt else x.astype(dt)

    feat2d = _as(features.reshape(M, H), cdt)
    wd = _as(w_dense, cdt)
    wdec = _as(w_dec, cdt)
    bd = _as(b_dense, jnp.float32).reshape(1, H)
    g = _as(gamma, jnp.float32).reshape(1, H)
    bt = _as(beta, jnp.float32).reshape(1, H)
    bdec = _as(b_dec, jnp.float32)

    if V_pad != V:
        # Pad vocab to a multiple of the lane width so real RoBERTa vocab
        # sizes never force a full-V weight tile, and output stores stay
        # unmasked lane-dense. Zero columns are sliced away below.
        wdec = jnp.pad(wdec, ((0, 0), (0, V_pad - V)))
        bdec = jnp.pad(bdec, (0, V_pad - V))
    bdec = bdec.reshape(1, V_pad)
    if M_pad != M:
        feat2d = jnp.pad(feat2d, ((0, M_pad - M), (0, 0)))

    # VMEM limit: sized from the actual double-buffered working set, capped
    # generation-aware (~54 MiB on v7x, ~108 MiB on v5e/v6e).
    vmem_est = _working_set_bytes(tm, tv, H, cdt.itemsize, odt.itemsize)
    vmem_limit = max(min(int(vmem_est * 1.25) + (4 << 20), vmem_budget),
                     min(32 << 20, vmem_budget))

    # Advisory cost estimate so XLA schedules around a correctly-sized call.
    flops = 2 * M_pad * H * H + 2 * M_pad * H * V_pad
    bytes_accessed = (M_pad * H * cdt.itemsize
                      + H * H * cdt.itemsize
                      + (M_pad // tm) * H * V_pad * cdt.itemsize  # w_dec streams
                      + M_pad * V_pad * odt.itemsize
                      + (3 * H + V_pad) * 4)
    cost = pl.CostEstimate(flops=flops, transcendentals=M_pad * H,
                           bytes_accessed=bytes_accessed)

    kernel = functools.partial(_lm_head_kernel, eps=eps)

    out2d = pl.pallas_call(
        kernel,
        out_shape=jax.ShapeDtypeStruct((M_pad, V_pad), odt),
        grid_spec=pltpu.PrefetchScalarGridSpec(
            num_scalar_prefetch=0,
            grid=(M_pad // tm, V_pad // tv),
            in_specs=[
                pl.BlockSpec((tm, H), lambda i, j: (i, 0)),   # feature rows
                pl.BlockSpec((H, H), lambda i, j: (0, 0)),    # dense weight
                pl.BlockSpec((1, H), lambda i, j: (0, 0)),    # dense bias
                pl.BlockSpec((1, H), lambda i, j: (0, 0)),    # LN gamma
                pl.BlockSpec((1, H), lambda i, j: (0, 0)),    # LN beta
                pl.BlockSpec((H, tv), lambda i, j: (0, j)),   # decoder weight tile
                pl.BlockSpec((1, tv), lambda i, j: (0, j)),   # decoder bias tile
            ],
            out_specs=pl.BlockSpec((tm, tv), lambda i, j: (i, j)),
            scratch_shapes=[pltpu.VMEM((tm, H), cdt)],
        ),
        compiler_params=pltpu.CompilerParams(
            dimension_semantics=("parallel", "arbitrary"),
            vmem_limit_bytes=vmem_limit),
        cost_estimate=cost,
    )(feat2d, wd, bd, g, bt, wdec, bdec)

    if M_pad != M or V_pad != V:
        out2d = out2d[:M, :V]
    return out2d.reshape(B, S, V)


def _reference(features, w_dense, b_dense, gamma, beta, w_dec, b_dec, eps=1e-5):
    x = features @ w_dense + b_dense
    x = 0.5 * x * (1.0 + lax.erf(x / jnp.sqrt(2.0)))
    mean = jnp.mean(x, axis=-1, keepdims=True)
    var = jnp.mean((x - mean) ** 2, axis=-1, keepdims=True)
    x = (x - mean) * lax.rsqrt(var + eps) * gamma + beta
    return x @ w_dec + b_dec


if __name__ == "__main__":
    # Small config; V deliberately NOT a multiple of 128 to exercise padding.
    B, S, H, V = 2, 8, 128, 1000
    eps = 1e-5

    key = jax.random.PRNGKey(0)
    k_feat, k_wd, k_bd, k_g, k_b, k_wdec, k_bdec = jax.random.split(key, 7)

    features = jax.random.normal(k_feat, (B, S, H), dtype=jnp.float32)
    # Deterministic synthetic parameters (module init shapes, not a checkpoint):
    w_dense = jax.random.normal(k_wd, (H, H), dtype=jnp.float32) * 0.02   # [in, out]
    b_dense = jax.random.normal(k_bd, (H,), dtype=jnp.float32) * 0.02
    gamma = 1.0 + 0.1 * jax.random.normal(k_g, (H,), dtype=jnp.float32)
    beta = 0.1 * jax.random.normal(k_b, (H,), dtype=jnp.float32)
    w_dec = jax.random.normal(k_wdec, (H, V), dtype=jnp.float32) * 0.02   # [in, out]
    b_dec = jax.random.normal(k_bdec, (V,), dtype=jnp.float32) * 0.02     # tied decoder bias

    ref = _reference(features, w_dense, b_dense, gamma, beta, w_dec, b_dec, eps=eps)

    # 1) Full-precision path with explicit small tiles: exercises multi-tile
    #    grid, h_scratch reuse across vocab tiles, and vocab padding. Must
    #    match the f32 reference tightly.
    out_f32 = lm_head(features, w_dense, b_dense, gamma, beta, w_dec, b_dec,
                      eps=eps, compute_dtype=jnp.float32,
                      out_dtype=jnp.float32, tm=8, tv=128)
    out_f32 = jax.block_until_ready(out_f32)
    assert out_f32.shape == (B, S, V)
    assert jnp.allclose(out_f32, ref, atol=1e-4, rtol=1e-4), "f32 mismatch vs reference"

    # 2) Default fast path: weights stored in bf16 once (hoisted cast), auto
    #    tiles from the generation-aware VMEM budget, bf16 logits.
    bf = jnp.bfloat16
    out_bf16 = lm_head(features.astype(bf), w_dense.astype(bf), b_dense, gamma,
                       beta, w_dec.astype(bf), b_dec, eps=eps)
    out_bf16 = jax.block_until_ready(out_bf16)
    assert out_bf16.shape == (B, S, V)
    assert out_bf16.dtype == bf
    assert jnp.allclose(out_bf16.astype(jnp.float32), ref, atol=4e-2, rtol=4e-2), \
        "bf16 mismatch vs reference"

    print("KERNEL_OK")
</pallas_src>

<mosaic_0001>
module attributes {stable_mosaic.version = 11 : i64} {
  func.func @_lm_head_kernel(%arg0: i32, %arg1: i32, %arg2: memref<8x128xf32, #tpu.memory_space<vmem>>, %arg3: memref<128x128xf32, #tpu.memory_space<vmem>>, %arg4: memref<1x128xf32, #tpu.memory_space<vmem>>, %arg5: memref<1x128xf32, #tpu.memory_space<vmem>>, %arg6: memref<1x128xf32, #tpu.memory_space<vmem>>, %arg7: memref<128x128xf32, #tpu.memory_space<vmem>>, %arg8: memref<1x128xf32, #tpu.memory_space<vmem>>, %arg9: memref<8x128xf32, #tpu.memory_space<vmem>>, %arg10: memref<8x128xf32, #tpu.memory_space<vmem>>) attributes {dimension_semantics = [#tpu.dimension_semantics<parallel>, #tpu.dimension_semantics<arbitrary>], iteration_bounds = array<i64: 2, 8>, scalar_prefetch = 0 : i64, scratch_operands = 1 : i64, tpu.core_type = #tpu.core_type<tc>, window_params = [{transform_indices = @transform_0, window_bounds = array<i64: 8, 128>}, {pipeline_mode = #tpu.pipeline_mode<synchronous>, transform_indices = @transform_1, window_bounds = array<i64: 128, 128>}, {pipeline_mode = #tpu.pipeline_mode<synchronous>, transform_indices = @transform_2, window_bounds = array<i64: 1, 128>}, {pipeline_mode = #tpu.pipeline_mode<synchronous>, transform_indices = @transform_3, window_bounds = array<i64: 1, 128>}, {pipeline_mode = #tpu.pipeline_mode<synchronous>, transform_indices = @transform_4, window_bounds = array<i64: 1, 128>}, {transform_indices = @transform_5, window_bounds = array<i64: 128, 128>}, {transform_indices = @transform_6, window_bounds = array<i64: 1, 128>}, {transform_indices = @transform_7, window_bounds = array<i64: 8, 128>}]} {
    %c0_i32 = arith.constant 0 : i32
    %0 = arith.cmpi eq, %arg1, %c0_i32 : i32
    %1 = arith.extui %0 : i1 to i32
    %c0_i32_0 = arith.constant 0 : i32
    %2 = arith.cmpi ne, %1, %c0_i32_0 : i32
    scf.if %2 {
      %c0_8 = arith.constant 0 : index
      %c0_9 = arith.constant 0 : index
      %10 = vector.load %arg2[%c0_8, %c0_9] : memref<8x128xf32, #tpu.memory_space<vmem>>, vector<8x128xf32>
      %c0_10 = arith.constant 0 : index
      %c0_11 = arith.constant 0 : index
      %11 = vector.load %arg3[%c0_10, %c0_11] : memref<128x128xf32, #tpu.memory_space<vmem>>, vector<128x128xf32>
      %cst_12 = arith.constant dense<0.000000e+00> : vector<8x128xf32>
      %12 = tpu.matmul %10, %11, %cst_12 {dimension_numbers = #tpu.dot_dimension_numbers<[1], [0], [0], [1], [0, 0, 1, 1], [], []>} : vector<8x128xf32>, vector<128x128xf32>, vector<8x128xf32> -> vector<8x128xf32>
      %c0_13 = arith.constant 0 : index
      %c0_14 = arith.constant 0 : index
      %13 = vector.load %arg4[%c0_13, %c0_14] : memref<1x128xf32, #tpu.memory_space<vmem>>, vector<1x128xf32>
      %14 = vector.broadcast %13 : vector<1x128xf32> to vector<8x128xf32>
      %15 = arith.addf %12, %14 : vector<8x128xf32>
      %cst_15 = arith.constant 5.000000e-01 : f32
      %16 = vector.broadcast %cst_15 : f32 to vector<8x128xf32>
      %17 = arith.mulf %16, %15 : vector<8x128xf32>
      %cst_16 = arith.constant 0.707106769 : f32
      %18 = vector.broadcast %cst_16 : f32 to vector<8x128xf32>
      %19 = arith.mulf %15, %18 : vector<8x128xf32>
      %20 = math.erf %19 : vector<8x128xf32>
      %cst_17 = arith.constant 1.000000e+00 : f32
      %21 = vector.broadcast %cst_17 : f32 to vector<8x128xf32>
      %22 = arith.addf %21, %20 : vector<8x128xf32>
      %23 = arith.mulf %17, %22 : vector<8x128xf32>
      %cst_18 = arith.constant dense<0.000000e+00> : vector<8xf32>
      %24 = vector.multi_reduction <add>, %23, %cst_18 [1] : vector<8x128xf32> to vector<8xf32>
      %25 = vector.shape_cast %24 : vector<8xf32> to vector<8x1xf32>
      %cst_19 = arith.constant 1.280000e+02 : f32
      %26 = vector.broadcast %cst_19 : f32 to vector<8x1xf32>
      %27 = arith.divf %25, %26 : vector<8x1xf32>
      %28 = vector.broadcast %27 : vector<8x1xf32> to vector<8x128xf32>
      %29 = arith.subf %23, %28 : vector<8x128xf32>
      %30 = arith.mulf %29, %29 : vector<8x128xf32>
      %cst_20 = arith.constant dense<0.000000e+00> : vector<8xf32>
      %31 = vector.multi_reduction <add>, %30, %cst_20 [1] : vector<8x128xf32> to vector<8xf32>
      %32 = vector.shape_cast %31 : vector<8xf32> to vector<8x1xf32>
      %cst_21 = arith.constant 1.280000e+02 : f32
      %33 = vector.broadcast %cst_21 : f32 to vector<8x1xf32>
      %34 = arith.divf %32, %33 : vector<8x1xf32>
      %35 = vector.broadcast %27 : vector<8x1xf32> to vector<8x128xf32>
      %36 = arith.subf %23, %35 : vector<8x128xf32>
      %cst_22 = arith.constant 9.99999974E-6 : f32
      %37 = vector.broadcast %cst_22 : f32 to vector<8x1xf32>
      %38 = arith.addf %34, %37 : vector<8x1xf32>
      %39 = math.rsqrt %38 : vector<8x1xf32>
      %40 = vector.broadcast %39 : vector<8x1xf32> to vector<8x128xf32>
      %41 = arith.mulf %36, %40 : vector<8x128xf32>
      %c0_23 = arith.constant 0 : index
      %c0_24 = arith.constant 0 : index
      %42 = vector.load %arg5[%c0_23, %c0_24] : memref<1x128xf32, #tpu.memory_space<vmem>>, vector<1x128xf32>
      %43 = vector.broadcast %42 : vector<1x128xf32> to vector<8x128xf32>
      %44 = arith.mulf %41, %43 : vector<8x128xf32>
      %c0_25 = arith.constant 0 : index
      %c0_26 = arith.constant 0 : index
      %45 = vector.load %arg6[%c0_25, %c0_26] : memref<1x128xf32, #tpu.memory_space<vmem>>, vector<1x128xf32>
      %46 = vector.broadcast %45 : vector<1x128xf32> to vector<8x128xf32>
      %47 = arith.addf %44, %46 : vector<8x128xf32>
      %c0_27 = arith.constant 0 : index
      %c0_28 = arith.constant 0 : index
      %48 = vector.load %arg10[%c0_27, %c0_28] : memref<8x128xf32, #tpu.memory_space<vmem>>, vector<8x128xf32>
      tpu.vector_store %arg10[%c0_27, %c0_28], %47 {strides = array<i32>} : memref<8x128xf32, #tpu.memory_space<vmem>>, vector<8x128xf32>,
    } else {
    }
    %c0 = arith.constant 0 : index
    %c0_1 = arith.constant 0 : index
    %3 = vector.load %arg10[%c0, %c0_1] : memref<8x128xf32, #tpu.memory_space<vmem>>, vector<8x128xf32>
    %c0_2 = arith.constant 0 : index
    %c0_3 = arith.constant 0 : index
    %4 = vector.load %arg7[%c0_2, %c0_3] : memref<128x128xf32, #tpu.memory_space<vmem>>, vector<128x128xf32>
    %cst = arith.constant dense<0.000000e+00> : vector<8x128xf32>
    %5 = tpu.matmul %3, %4, %cst {dimension_numbers = #tpu.dot_dimension_numbers<[1], [0], [0], [1], [0, 0, 1, 1], [], []>} : vector<8x128xf32>, vector<128x128xf32>, vector<8x128xf32> -> vector<8x128xf32>
    %c0_4 = arith.constant 0 : index
    %c0_5 = arith.constant 0 : index
    %6 = vector.load %arg8[%c0_4, %c0_5] : memref<1x128xf32, #tpu.memory_space<vmem>>, vector<1x128xf32>
    %7 = vector.broadcast %6 : vector<1x128xf32> to vector<8x128xf32>
    %8 = arith.addf %5, %7 : vector<8x128xf32>
    %c0_6 = arith.constant 0 : index
    %c0_7 = arith.constant 0 : index
    %9 = vector.load %arg9[%c0_6, %c0_7] : memref<8x128xf32, #tpu.memory_space<vmem>>, vector<8x128xf32>
    tpu.vector_store %arg9[%c0_6, %c0_7], %8 {strides = array<i32>} : memref<8x128xf32, #tpu.memory_space<vmem>>, vector<8x128xf32>,
    return
  }
  func.func @transform_0(%arg0: i32, %arg1: i32) -> (i32, i32) {
    %c0_i32 = arith.constant 0 : i32
    %c0_i32_0 = arith.constant 0 : i32
    return %arg0, %c0_i32 : i32, i32
  }
  func.func @transform_1(%arg0: i32, %arg1: i32) -> (i32, i32) {
    %c0_i32 = arith.constant 0 : i32
    %c0_i32_0 = arith.constant 0 : i32
    %c0_i32_1 = arith.constant 0 : i32
    return %c0_i32, %c0_i32_0 : i32, i32
  }
  func.func @transform_2(%arg0: i32, %arg1: i32) -> (i32, i32) {
    %c0_i32 = arith.constant 0 : i32
    %c0_i32_0 = arith.constant 0 : i32
    %c0_i32_1 = arith.constant 0 : i32
    return %c0_i32, %c0_i32_0 : i32, i32
  }
  func.func @transform_3(%arg0: i32, %arg1: i32) -> (i32, i32) {
    %c0_i32 = arith.constant 0 : i32
    %c0_i32_0 = arith.constant 0 : i32
    %c0_i32_1 = arith.constant 0 : i32
    return %c0_i32, %c0_i32_0 : i32, i32
  }
  func.func @transform_4(%arg0: i32, %arg1: i32) -> (i32, i32) {
    %c0_i32 = arith.constant 0 : i32
    %c0_i32_0 = arith.constant 0 : i32
    %c0_i32_1 = arith.constant 0 : i32
    return %c0_i32, %c0_i32_0 : i32, i32
  }
  func.func @transform_5(%arg0: i32, %arg1: i32) -> (i32, i32) {
    %c0_i32 = arith.constant 0 : i32
    %c0_i32_0 = arith.constant 0 : i32
    return %c0_i32, %arg1 : i32, i32
  }
  func.func @transform_6(%arg0: i32, %arg1: i32) -> (i32, i32) {
    %c0_i32 = arith.constant 0 : i32
    %c0_i32_0 = arith.constant 0 : i32
    return %c0_i32, %arg1 : i32, i32
  }
  func.func @transform_7(%arg0: i32, %arg1: i32) -> (i32, i32) {
    %c0_i32 = arith.constant 0 : i32
    return %arg0, %arg1 : i32, i32
  }
}

</mosaic_0001>

<bundles_post_ra>
// kernel: tpu_custom_call.1
= control target key start
LH: loop header
LB: loop body
LE: loop exit
PB: predicated region body
PF: predicated region fallthrough
CT: control target
= control target key end

     0   :  { %s1537_s0 = inlined_call_operand.hbm [shape: f32[16,128], index: 0, kind: input, shape index: {}]   ;;  %s1538_s1 = inlined_call_operand.hbm [shape: f32[128,128], index: 1, kind: input, shape index: {}]   ;;  %s1539_s2 = inlined_call_operand.vmem [shape: f32[1,128], index: 2, kind: input, shape index: {}]   ;;  %s1540_s3 = inlined_call_operand.vmem [shape: f32[1,128], index: 3, kind: input, shape index: {}]   ;;  %s1541_s4 = inlined_call_operand.vmem [shape: f32[1,128], index: 4, kind: input, shape index: {}]   ;;  %s1542_s5 = inlined_call_operand.hbm [shape: f32[128,1024], index: 5, kind: input, shape index: {}]   ;;  %s1543_s6 = inlined_call_operand.hbm [shape: f32[1,1024], index: 6, kind: input, shape index: {}]   ;;  %s1544_s7 = inlined_call_operand.hbm [shape: f32[16,1024], index: 7, kind: output, shape index: {}]  }
   0x1   :  { %1554 = sst [smem:[#allocation26_spill]] %s1537_s0 }
   0x2   :  { %1555 = sst [smem:[#allocation27_spill]] %s1540_s3 }
   0x3   :  { %1556 = sst [smem:[#allocation28_spill]] %s1541_s4 }
   0x4   :  { %1557 = sst [smem:[#allocation29_spill]] %s1544_s7 }
   0x5   :  { %12 = vsyncpa [#allocation4], 0 }
   0x6   :  { %14 = vsyncpa [#allocation4 + $0x1], 0 }
   0x7   :  { %15 = vsyncpa [#allocation7], 0 }
   0x8   :  { %16 = vsyncpa [#allocation5], 0 }
   0x9   :  { %18 = vsyncpa [#allocation5 + $0x1], 0  ;;  %s1216_s24 = smov 0   ;;  %s1218_s25 = smov 0  }
   0xa   :  { %s1220_s26 = smov 0   ;;  %s1222_s27 = smov 0  }
   0xb   :  { %s1224_s28 = smov 0   ;;  %s1226_s29 = smov 0  }
   0xc   :  { %s1228_s30 = smov 0   ;;  %s1230_s8 = smov 0  }
   0xd   :  { %s1232_s9 = smov 0   ;;  %s1234_s10 = smov 0  }
   0xe   :  { %s1236_s11 = smov 0   ;;  %s1238_s12 = smov 0  }
   0xf   :  { %s1240_s13 = smov 0   ;;  %s1242_s14 = smov 0  }
  0x10 LB: > { %1558 = sst [smem:[#allocation15_spill]] %s1117_s24  ;;  %s1285_s15 = sadd.s32 4294967295, %s1169_s14   ;;  %s1169_s14 = sphi %s1242_s14, %s24_s14   ;;  %s1165_s13 = sphi %s1240_s13, %s1606_s13   ;;  %s1161_s12 = sphi %s1238_s12, %s1605_s12   ;;  %s1157_s11 = sphi %s1236_s11, %s1592_s11   ;;  %s1153_s10 = sphi %s1234_s10, %s1604_s10   ;;  %s1149_s9 = sphi %s1232_s9, %s1603_s9   ;;  %s1145_s8 = sphi %s1230_s8, %s1602_s8   ;;  %s1141_s30 = sphi %s1228_s30, %s1601_s30   ;;  %s1137_s29 = sphi %s1226_s29, %s1600_s29   ;;  %s1133_s28 = sphi %s1224_s28, %s1599_s28   ;;  %s1129_s27 = sphi %s1222_s27, %s1598_s27   ;;  %s1125_s26 = sphi %s1220_s26, %s1588_s26   ;;  %s1121_s25 = sphi %s1218_s25, %s1597_s25   ;;  %s1117_s24 = sphi %s1216_s24, %s1596_s24  }
  0x11   : > { %1559 = sst [smem:[#allocation16_spill]] %s1125_s26  ;;  %s33_s17 = sadd.s32 1, %s1161_s12 }
  0x12   : > { %1560 = sst [smem:[#allocation17_spill]] %s1149_s9  ;;  %s36_s18 = sadd.s32 1, %s1165_s13 }
  0x13   : > { %1561 = sst [smem:[#allocation18_spill]] %s1157_s11  ;;  %p34_p0 = scmp.ge.s32.totalorder %s33_s17, 8 }
  0x14   : > { %1562 = sst [smem:[#allocation19_spill]] %s1165_s13  ;;  %s43_s19 = sadd.s32 1, %s1149_s9 }
  0x15   : > { %p50_p1 = scmp.ne.s32.totalorder %s1149_s9, %s1145_s8  ;;  %p51_p2 = scmp.eq.s32.totalorder %s1169_s14, 0 }
  0x16   : > { %s1608_s17 = smov (%p34_p0, %s33_s17), 0  ;;  %s1610_s18 = smov (!%p34_p0, %s36_s18), %s1165_s13 }
  0x17   : > { %1563 = sst [smem:[#allocation20_spill]] %s1608_s17  ;;  %p1299_p3 = por %p51_p2, %p50_p1 }
  0x18   : > { %p56_p4 = scmp.ne.s32.totalorder %s1145_s8, %s1141_s30  ;;  %p38_p5 = scmp.ge.s32.totalorder %s1610_s18, 2 }
  0x19   : > { %p57_p6 = scmp.eq.s32.totalorder %s1285_s15, 0  ;;  %s150_s21 = ssub.s32 %s1161_s12, %s1608_s17 }
  0x1a   : > { %s153_s22 = sadd.s32 1, %s1137_s29  ;;  %s1612_s18 = smov (%p38_p5, %s1610_s18), 0 }
  0x1b   : > { %1565 = sst [smem:[#allocation21_spill]] %s1612_s18  ;;  %p1312_p7 = por %p57_p6, %p56_p4 }
  0x1c   : > { %p151_p8 = scmp.eq.s32.totalorder %s150_s21, 0  ;;  %s40_s30 = ssub.s32 %s1165_s13, %s1612_s18 }
  0x1d   : > { %p160_p9 = scmp.ne.s32.totalorder %s1137_s29, %s1133_s28  ;;  %p41_p10 = scmp.eq.s32.totalorder %s40_s30, 0 }
  0x1e   : > { %p166_p11 = scmp.ne.s32.totalorder %s1133_s28, %s1129_s27  ;;  %s204_s11 = sor.u32 %s150_s21, %s40_s30 }
  0x1f   : > { %s1323_s16 = scalar_select %p151_p8, %s1137_s29, %s153_s22  }
  0x20   : > { %s1326_s17 = scalar_select %p41_p10, %s1149_s9, %s43_s19  }
  0x21   : > { %1567 = sst [smem:[#allocation22_spill]] %s1323_s16  ;;  %p1330_p12 = por %p160_p9, %p51_p2 }
  0x22   : > { %1568 = sst [smem:[#allocation23_spill]] %s1326_s17  ;;  %p1336_p13 = por %p166_p11, %p57_p6 }
  0x23   : > { %s207_s4 = sadd.s32 1, %s1125_s26  ;;  %p205_p0 = scmp.eq.s32.totalorder %s204_s11, 0 }
  0x24   : > { %p217_p1 = scmp.ne.s32.totalorder %s1125_s26, %s1121_s25  ;;  %p218_p4 = scmp.eq.s32.totalorder %s1285_s15, 15 }
  0x25   : > { %p223_p5 = scmp.ne.s32.totalorder %s1121_s25, %s1117_s24  ;;  %s1574_s22 = sadd.s32 4294967294, %s1169_s14  }
  0x26   : > { %s1347_s27 = scalar_select %p205_p0, %s1125_s26, %s207_s4  }
  0x27   : > { %p1349_p2 = por %p218_p4, %p217_p1  ;;  %p224_p8 = scmp.eq.s32.totalorder %s1574_s22, 15 }
  0x28   : > { %1571 = sst [smem:[#allocation24_spill]] %s1347_s27  ;;  %p765_p10 = scmp.lt.s32.totalorder %s1169_s14, 16 }
  0x29   : > { %s1572_s19 = scalar_select %p1349_p2, 1, 0 }
  0x2a   : > { %p1355_p9 = por %p224_p8, %p223_p5  ;;  %s267_s11 = sand.u32 1, %s1169_s14  }
  0x2b   : > { %1573 = sst [smem:[#allocation25_spill]] %s1572_s19  ;;  %s269_s21 = sand.u32 1, %s1149_s9  }
  0x2c   : > { %s718_s30 = sshll.u32 %s269_s21, 3  ;;  %s719_s16 = sshll.u32 %s1165_s13, 3 }
  0x2d   : > { %s1576_s0 = sld [smem:[#allocation26_spill]]  ;;  %s271_s24 = scalar_lea.vmem [#allocation3], %s718_s30 }
  0x2e   : > { %s279_s3 = sshll.u32 %s271_s24, 4  ;;  %p751_p11 = pnand %p765_p10, %p1299_p3  ;;  %s280_s3 = int_to_ptr.vmem [resolvable:$true] %s279_s3 }
  0x2f   : > { %p1370_p0 = pnand %p765_p10, %p1330_p12  ;;  %s1374_s21 = scalar_lea.sflag [#allocation4], %s267_s11 }
  0x30   : > { %s1171_s13 = smov 1024   ;;  %s1172_s11 = smov 128  }
  0x31   : > { %s1173_s9 = smov 8   ;;  %p715_p3 = scmp.ge.s32.totalorder %s1169_s14, 1 }
  0x32   : > { %p231_p12 = scmp.lt.s32.totalorder %s1169_s14, 17  ;;  %s1174_s27 = smov [#allocation6]  }
  0x33   : > { %s275_s26 = scalar_lea.hbm %s1576_s0, %s719_s16  ;;  %s288_s16 = sand.u32 1, %s1137_s29  }
  0x34   : > { %s277_s19 = sshll.u32 %s275_s26, 4  ;;  %s720_s24 = sshll.u32 %s288_s16, 7  ;;  %s278_s19 = int_to_ptr.hbm [resolvable:$true] %s277_s19 }
  0x35   : > { %753 = dma.hbm_to_vmem [thread:$0]  (!%p751_p11), %s278_s19, 128, %s280_s3, %s1374_s21  }
  0x36   : > { %s721_s26 = sshll.u32 %s1161_s12, 3  ;;  %s290_s4 = scalar_lea.vmem [#allocation8], %s720_s24 }
  0x37   : > { %s294_s20 = scalar_lea.hbm %s1542_s5, %s721_s26  ;;  %s297_s0 = sshll.u32 %s290_s4, 4  ;;  %s298_s0 = int_to_ptr.vmem [resolvable:$true] %s297_s0 }
  0x38   : > { %s295_s7 = sshll.u32 %s294_s20, 4  ;;  %s242_s26 = sshll.u32 %s1538_s1, 4  ;;  %s296_s7 = int_to_ptr.hbm [resolvable:$true] %s295_s7  ;;  %s243_s26 = int_to_ptr.hbm [resolvable:$true] %s242_s26 }
  0x39   : > { %756 = dma.hbm_to_vmem [thread:$0]  (!%p1370_p0), %s296_s7, 2048, %s298_s0, %s1374_s21, %s1171_s13, %s1172_s11, %s1173_s9  }
  0x3a   : > { %p1390_p1 = pnand %p715_p3, %p231_p12  ;;  %s244_s30 = sshll.u32 %s1174_s27, 4  ;;  %s245_s30 = int_to_ptr.vmem [resolvable:$true] %s244_s30 }
  0x3b   : > { %s313_s13 = scalar_lea.hbm %s1543_s6, %s1161_s12  ;;  %s310_s4 = scalar_lea.vmem [#allocation9], %s288_s16 }
  0x3c   : > { %p746_p4 = pneg %p1390_p1  ;;  %s315_s7 = sshll.u32 %s313_s13, 4  ;;  %s316_s7 = int_to_ptr.hbm [resolvable:$true] %s315_s7 }
  0x3d   : > { %s317_s3 = sshll.u32 %s310_s4, 4  ;;  %326 = sbr.rel (%p1390_p1) target bundleno = 724 (0x2d4), region = 48  ;;  %s318_s3 = int_to_ptr.vmem [resolvable:$true] %s317_s3 }
  0x3e   : > { %p747_p5 = pnand %p746_p4, %p57_p6  ;;  %s328_s19 = sand.u32 (!%p1390_p1), 1, %s1285_s15  }
  0x3f   : > { %759 = dma.hbm_to_vmem [thread:$0]  (!%p1370_p0), %s316_s7, 16, %s318_s3, %s1374_s21  }
  0x40   : > { %749 = dma.hbm_to_vmem [thread:$0]  (!%p747_p5), %s243_s26, 2048, %s245_s30, [#allocation7], %s1172_s11, %s1172_s11, %s1173_s9  }
  0x41   : > { %s330_s27 = sand.u32 (!%p1390_p1), 1, %s1145_s8   ;;  %s329_s16 = scalar_lea.sflag (!%p1390_p1), [#allocation4], %s328_s19 }
  0x42   : > { %s1409_s20 = sshll.u32 %s330_s27, 3 }
  0x43   : > { %s332_s0 = scalar_lea.vmem [#allocation3], %s1409_s20 }
  0x44   : > { %1100 = dma.done.wait (%p1312_p7), %s329_s16, 128  }
  0x45   : > { %1102 = vsyncadd (%p1312_p7), %s329_s16, 4294967168 }
  0x46   : > { %1104 = dma.done.wait (%p57_p6), [#allocation7], 2048  }
  0x47   : > { %1106 = vsyncadd (%p57_p6), [#allocation7], 4294965248  ;;  %s345_s9 = sand.u32 1, %s1133_s28  }
  0x48   : > { %s725_s22 = sshll.u32 %s345_s9, 7 }
  0x49   : > { %s1421_s21 = scalar_lea.vmem [#allocation8], %s725_s22 }
  0x4a   : > { %1108 = dma.done.wait (%p1336_p13), %s329_s16, 2064  }
  0x4b   : > { %1110 = vsyncadd (%p1336_p13), %s329_s16, 4294965232  ;;  %s394_s23 = sand.u32 1, %s1121_s25   ;;  %s1432_s15 = scalar_lea.vmem [#allocation9], %s345_s9 }
  0x4c   : > { %s1430_s11 = sshll.u32 %s394_s23, 3  ;;  %p727_p6 = scmp.ne.s32.totalorder %s1153_s10, 0 }
  0x4d   : > { %s396_s26 = scalar_lea.vmem [#allocation10], %s1430_s11  ;;  %s1579_s7 = sld [smem:[#allocation27_spill]] (!%p727_p6) }
  0x4e   : > { %400 = sbr.rel (%p727_p6) target bundleno = 561 (0x231), region = 68  ;;  %s1580_s19 = sld [smem:[#allocation28_spill]] (!%p727_p6) }
  0x53   : > { %v417_v0 = vld [vmem:[#allocation6 + $0x78] sm:$0xff]  ;;  %v416_v1 = vld [vmem:[#allocation6 + $0x70] sm:$0xff]  ;;  %v415_v2 = vld [vmem:[#allocation6 + $0x68] sm:$0xff]  ;;  %v1175_v59 = vmov 128.0  }
  0x54   : > { %422 = vmatpush.msra.mxu0 %v417_v0  ;;  %v414_v3 = vld [vmem:[#allocation6 + $0x60] sm:$0xff]  ;;  %v413_v4 = vld [vmem:[#allocation6 + $0x58] sm:$0xff]  ;;  %v412_v5 = vld [vmem:[#allocation6 + $0x50] sm:$0xff] }
  0x55   : > { %v411_v6 = vld [vmem:[#allocation6 + $0x48] sm:$0xff]  ;;  %v410_v7 = vld [vmem:[#allocation6 + $0x40] sm:$0xff]  ;;  %v409_v8 = vld [vmem:[#allocation6 + $0x38] sm:$0xff] }
  0x56   : > { %423 = vmatpush.msra.mxu0 %v416_v1  ;;  %v408_v9 = vld [vmem:[#allocation6 + $0x30] sm:$0xff]  ;;  %v407_v10 = vld [vmem:[#allocation6 + $0x28] sm:$0xff]  ;;  %v406_v11 = vld [vmem:[#allocation6 + $0x20] sm:$0xff] }
  0x57   : > { %v405_v12 = vld [vmem:[#allocation6 + $0x18] sm:$0xff]  ;;  %v404_v13 = vld [vmem:[#allocation6 + $0x10] sm:$0xff]  ;;  %v403_v14 = vld [vmem:[#allocation6 + $0x8] sm:$0xff] }
  0x58   : > { %424 = vmatpush.msra.mxu0 %v415_v2  ;;  %v402_v15 = vld [vmem:[#allocation6] sm:$0xff]  ;;  %v401_v16 = vld [vmem:[%s332_s0] sm:$0xff]  ;;  %v885_v17 = vld [vmem:[%s1539_s2] ss:$0 sm:$0xff] }
  0x5a   : > { %425 = vmatpush.msra.mxu0 %v414_v3 }
  0x5c   : > { %426 = vmatpush.msra.mxu0 %v413_v4 }
  0x5e   : > { %427 = vmatpush.msra.mxu0 %v412_v5 }
  0x60   : > { %428 = vmatpush.msra.mxu0 %v411_v6 }
  0x62   : > { %429 = vmatpush.msra.mxu0 %v410_v7 }
  0x64   : > { %430 = vmatpush.msra.mxu0 %v409_v8 }
  0x66   : > { %431 = vmatpush.msra.mxu0 %v408_v9 }
  0x68   : > { %432 = vmatpush.msra.mxu0 %v407_v10 }
  0x6a   : > { %433 = vmatpush.msra.mxu0 %v406_v11 }
  0x6c   : > { %434 = vmatpush.msra.mxu0 %v405_v12 }
  0x6e   : > { %435 = vmatpush.msra.mxu0 %v404_v13 }
  0x70   : > { %436 = vmatpush.msra.mxu0 %v403_v14 }
  0x72   : > { %437 = vmatpush.msra.mxu0 %v402_v15  ;;  %v886_v15 = vld [vmem:[%s1579_s7] ss:$0 sm:$0xff] }
  0x73   : > { %438 = vmatmul.f32.vlgmr.msra.gmra.mxu0 %v401_v16 }
  0xf0   : > { %v439_v18 = vpop.f32.mrf.mxu0 }
  0xf1   : > { %v440_v19 = vadd.f32 %v885_v17, %v439_v18  ;;  %v887_v17 = vld [vmem:[%s1580_s19] ss:$0 sm:$0xff] }
  0xf3   : > { %v443_v20 = vmul.f32 0.70710677, %v440_v19  ;;  %v442_v56 = vmul.f32 0.5, %v440_v19 }
  0xf5   : > { %v444_v21 = vmul.f32 %v443_v20, %v443_v20 }
  0xf7   : > { %v445_v22 = vmin.f32 %v444_v21, 16.0 }
  0xf9   : > { %v446_v23 = vmul.f32 2.1237322e-06, %v445_v22  ;;  %v457_v24 = vmul.f32 3.8918573e-05, %v445_v22 }
  0xfb   : > { %v447_v25 = vadd.f32 0.00028619796, %v446_v23  ;;  %v458_v26 = vadd.f32 0.001143296, %v457_v24 }
  0xfd   : > { %v448_v27 = vmul.f32 %v447_v25, %v445_v22  ;;  %v459_v28 = vmul.f32 %v458_v26, %v445_v22 }
  0xff   : > { %v460_v29 = vadd.f32 0.014752088, %v459_v28  ;;  %v449_v30 = vadd.f32 0.0036580483, %v448_v27 }
 0x101   : > { %v461_v31 = vmul.f32 %v460_v29, %v445_v22  ;;  %v450_v33 = vmul.f32 %v449_v30, %v445_v22 }
 0x103   : > { %v462_v32 = vadd.f32 0.112945676, %v461_v31  ;;  %v451_v36 = vadd.f32 0.05243302, %v450_v33 }
 0x105   : > { %v463_v34 = vmul.f32 %v462_v32, %v445_v22  ;;  %v452_v39 = vmul.f32 %v451_v36, %v445_v22 }
 0x107   : > { %v464_v35 = vadd.f32 0.4994258, %v463_v34  ;;  %v453_v40 = vadd.f32 0.18741608, %v452_v39 }
 0x109   : > { %v465_v37 = vmul.f32 %v464_v35, %v445_v22  ;;  %v454_v42 = vmul.f32 %v453_v40, %v445_v22 }
 0x10b   : > { %v466_v38 = vadd.f32 1.0, %v465_v37  ;;  %v455_v46 = vadd.f32 1.1283791, %v454_v42 }
 0x10d   : > { %888 = vrcp.f32 %v466_v38  ;;  %v478_v45 = vand.u32 2147483648, %v466_v38  ;;  %v476_v48 = vand.u32 2147483647, %v466_v38  ;;  %vm472_vm1 = vweird.f32 %v466_v38 }
 0x10e   : > { %v456_v51 = vmul.f32 %v455_v46, %v443_v20  ;;  %890 = vrcp.f32 %v1175_v59 }
 0x10f   : > { %v479_v50 = vor.u32 1.1754944e-38, %v478_v45  ;;  %vm477_vm3 = vcmp.eq.f32.partialorder %v476_v48, 8.507059e+37 }
 0x113   : > { %v889_v41 = vpop.eup %888 }
 0x114   : > { %v468_v43 = vmul.f32 %v889_v41, %v466_v38  ;;  %vm473_vm0 = vweird.f32 %v889_v41  ;;  %v891_v60 = vpop.eup %890 }
 0x115   : > { %vm474_vm2 = vmor %vm472_vm1, %vm473_vm0  ;;  %v489_v61 = vmul.f32 128.0, %v891_v60  ;;  %vm493_vm4 = vweird.f32 %v891_v60 }
 0x116   : > { %v469_v44 = vsub.f32 1.0, %v468_v43 }
 0x117   : > { %v490_v62 = vsub.f32 1.0, %v489_v61 }
 0x118   : > { %v470_v47 = vmul.f32 %v889_v41, %v469_v44 }
 0x119   : > { %v491_v63 = vmul.f32 %v891_v60, %v490_v62 }
 0x11a   : > { %v471_v49 = vadd.f32 %v889_v41, %v470_v47 }
 0x11b   : > { %v492_v0 = vadd.f32 %v891_v60, %v491_v63 }
 0x11c   : > { %v475_v52 = vsel %vm474_vm2, %v889_v41, %v471_v49 }
 0x11d   : > { %v480_v53 = vsel %vm477_vm3, %v479_v50, %v475_v52  ;;  %v494_v1 = vsel %vm493_vm4, %v891_v60, %v492_v0 }
 0x11e   : > { %v481_v54 = vmul.f32 %v480_v53, %v456_v51 }
 0x120   : > { %v728_v55 = vclamps-f32 %v481_v54, 1.0 }
 0x122   : > { %v484_v57 = vadd.f32 1.0, %v728_v55 }
 0x124   : > { %v485_v58 = vmul.f32 %v484_v57, %v442_v56 }
 0x126   : > { %486 = vadd.xlane.f32.xlu0 %v485_v58 }
 0x199   : > { %v487_v2 = vpop.xlane.xlu0 %486 }
 0x19a   : > { %v495_v3 = vmul.f32 %v494_v1, %v487_v2 }
 0x19c   : > { %v496_v4 = vsub.f32 %v485_v58, %v495_v3 }
 0x19e   : > { %v497_v5 = vmul.f32 %v496_v4, %v496_v4 }
 0x1a0   : > { %498 = vadd.xlane.f32.xlu0 %v497_v5 }
 0x213   : > { %v499_v6 = vpop.xlane.xlu0 %498 }
 0x214   : > { %v500_v7 = vmul.f32 %v499_v6, %v494_v1 }
 0x216   : > { %v501_v8 = vadd.f32 1e-05, %v500_v7 }
 0x218   : > { %892 = vrsqrt.f32 %v501_v8  ;;  %vm508_vm6 = vweird.f32 %v501_v8 }
 0x21e   : > { %v893_v9 = vpop.eup %892 }
 0x21f   : > { %v503_v10 = vmul.f32 %v893_v9, %v501_v8  ;;  %vm509_vm5 = vweird.f32 %v893_v9 }
 0x220   : > { %vm510_vm7 = vmor %vm508_vm6, %vm509_vm5 }
 0x221   : > { %v504_v11 = vmul.f32 %v893_v9, %v503_v10 }
 0x223   : > { %v505_v12 = vmul.f32 0.5, %v504_v11 }
 0x225   : > { %v506_v13 = vsub.f32 1.5, %v505_v12 }
 0x227   : > { %v507_v14 = vmul.f32 %v893_v9, %v506_v13 }
 0x229   : > { %v511_v16 = vsel %vm510_vm7, %v893_v9, %v507_v14 }
 0x22a   : > { %v512_v18 = vmul.f32 %v511_v16, %v496_v4 }
 0x22c   : > { %v517_v19 = vmul.f32 %v886_v15, %v512_v18 }
 0x22e   : > { %v522_v20 = vadd.f32 %v887_v17, %v517_v19 }
 0x230   : > { %523 = vst [vmem:[#allocation2] sm:$0xff] %v522_v20 }
 0x231 PF: > { %v540_v21 = vld [vmem:[%s1421_s21 + $0x78] sm:$0xff]  ;;  %v539_v22 = vld [vmem:[%s1421_s21 + $0x70] sm:$0xff]  ;;  %v538_v23 = vld [vmem:[%s1421_s21 + $0x68] sm:$0xff]  ;;  %s1581_s27 = sld [smem:[#allocation18_spill]]  ;;  %s581_s13 = sshll.u32 %s396_s26, 4  ;;  %s582_s13 = int_to_ptr.vmem [resolvable:$true] %s581_s13 }
 0x232   : > { %545 = vmatpush.msra.mxu0 %v540_v21  ;;  %v537_v24 = vld [vmem:[%s1421_s21 + $0x60] sm:$0xff]  ;;  %v536_v25 = vld [vmem:[%s1421_s21 + $0x58] sm:$0xff]  ;;  %v535_v26 = vld [vmem:[%s1421_s21 + $0x50] sm:$0xff]  ;;  %s1583_s24 = sld [smem:[#allocation29_spill]] }
 0x233   : > { %v534_v27 = vld [vmem:[%s1421_s21 + $0x48] sm:$0xff]  ;;  %v533_v28 = vld [vmem:[%s1421_s21 + $0x40] sm:$0xff]  ;;  %v532_v29 = vld [vmem:[%s1421_s21 + $0x38] sm:$0xff] }
 0x234   : > { %546 = vmatpush.msra.mxu0 %v539_v22  ;;  %v531_v30 = vld [vmem:[%s1421_s21 + $0x30] sm:$0xff]  ;;  %v530_v31 = vld [vmem:[%s1421_s21 + $0x28] sm:$0xff]  ;;  %v529_v32 = vld [vmem:[%s1421_s21 + $0x20] sm:$0xff] }
 0x235   : > { %v528_v33 = vld [vmem:[%s1421_s21 + $0x18] sm:$0xff]  ;;  %v527_v34 = vld [vmem:[%s1421_s21 + $0x10] sm:$0xff]  ;;  %v526_v35 = vld [vmem:[%s1421_s21 + $0x8] sm:$0xff] }
 0x236   : > { %547 = vmatpush.msra.mxu0 %v538_v23  ;;  %v525_v36 = vld [vmem:[%s1421_s21] sm:$0xff]  ;;  %v894_v38 = vld [vmem:[%s1432_s15] ss:$0 sm:$0xff]  ;;  %s567_s21 = scalar_lea.sflag [#allocation5], %s394_s23 }
 0x237   : > { %v524_v37 = vld [vmem:[#allocation2] sm:$0xff]  ;;  %s730_s20 = sshll.u32 %s1581_s27, 3 }
 0x238   : > { %548 = vmatpush.msra.mxu0 %v537_v24  ;;  %s577_s16 = sadd.s32 %s1153_s10, %s730_s20  ;;  %s1584_s7 = smov %s1583_s24 }
 0x239   : > { %s731_s9 = sshll.u32 %s577_s16, 3  ;;  %s1035_s27 = scalar_lea.hbm %s1584_s7, 128 }
 0x23a   : > { %549 = vmatpush.msra.mxu0 %v536_v25  ;;  %s579_s30 = scalar_lea.hbm %s1583_s24, %s731_s9 }
 0x23b   : > { %s583_s4 = sshll.u32 %s579_s30, 4  ;;  %s584_s4 = int_to_ptr.hbm [resolvable:$true] %s583_s4 }
 0x23c   : > { %550 = vmatpush.msra.mxu0 %v535_v26  ;;  %s1029_s3 = sshra.s32 %s584_s4, 4  ;;  %s1030_s3 = int_to_ptr.hbm [resolvable:$true] %s1029_s3 }
 0x23d   : > { %s1031_s10 = scalar_lea.hbm %s1030_s3, 8  ;;  %p1036_p10 = scmp.lt.s32.totalorder %s1030_s3, %s1584_s7 }
 0x23e   : > { %551 = vmatpush.msra.mxu0 %v534_v27  ;;  %p1032_p7 = scmp.ne.s32.totalorder %s1030_s3, %s1031_s10  ;;  %p1037_p11 = scmp.lt.s32.totalorder %s1035_s27, %s1031_s10 }
 0x240   : > { %552 = vmatpush.msra.mxu0 %v533_v28  ;;  %p1033_p13 = pnand %p1032_p7, %p1349_p2  ;;  %p1038_p0 = por %p1037_p11, %p1036_p10 }
 0x242   : > { %553 = vmatpush.msra.mxu0 %v532_v29  ;;  %p1034_p8 = pneg %p1033_p13 }
 0x244   : > { %554 = vmatpush.msra.mxu0 %v531_v30  ;;  %p1039_p3 = pnand %p1038_p0, %p1034_p8 }
 0x246   : > { %555 = vmatpush.msra.mxu0 %v530_v31 }
 0x248   : > { %556 = vmatpush.msra.mxu0 %v529_v32 }
 0x24a   : > { %557 = vmatpush.msra.mxu0 %v528_v33 }
 0x24c   : > { %558 = vmatpush.msra.mxu0 %v527_v34 }
 0x24e   : > { %559 = vmatpush.msra.mxu0 %v526_v35 }
 0x250   : > { %560 = vmatpush.msra.mxu0 %v525_v36 }
 0x251   : > { %561 = vmatmul.f32.vlgmr.msra.gmra.mxu0 %v524_v37 }
 0x2ce   : > { %v562_v39 = vpop.f32.mrf.mxu0 }
 0x2cf   : > { %v563_v40 = vadd.f32 %v894_v38, %v562_v39 }
 0x2d1   : > { %565 = vst [vmem:[%s396_s26] sm:$0xff] %v563_v40 }
 0x2d2   : > { %1042 = shalt.err (!%p1039_p3)
}
 0x2d3   : > { %744 = dma.vmem_to_hbm [thread:$0]  (%p1349_p2), %s582_s13, 128, %s584_s4, %s567_s21  }
 0x2d4 PF: > { %s1585_s23 = sld [smem:[#allocation15_spill]]  ;;  %p767_p12 = scmp.ge.s32.totalorder %s1169_s14, 2 }
 0x2d6   : > { %p761_p1 = pnand %p767_p12, %p1355_p9 }
 0x2d8   : > { %p762_p4 = pneg %p761_p1 }
 0x2da   : > { %s595_s11 = sand.u32 1, %s1585_s23  }
 0x2db   : > { %s596_s26 = scalar_lea.sflag [#allocation5], %s595_s11 }
 0x2dc   : > { %1112 = dma.done.wait (%p762_p4), %s596_s26, 128  }
 0x2dd   : > { %1114 = vsyncadd (%p762_p4), %s596_s26, 4294967168  ;;  %s24_s14 = sadd.s32 1, %s1169_s14   ;;  %s1587_s0 = sld [smem:[#allocation16_spill]] }
 0x2de   : > { %p1490_p5 = scmp.ge.s32.totalorder %s24_s14, 18   ;;  %s1588_s26 = sld [smem:[#allocation24_spill]] }
 0x2df   : > { %s1589_s22 = sld [smem:[#allocation22_spill]]  ;;  %s1596_s24 = smov %s1121_s25 }
 0x2e0   : > { %s1590_s18 = sld [smem:[#allocation17_spill]]  ;;  %s1598_s27 = smov %s1133_s28 }
 0x2e1   : > { %s1591_s17 = sld [smem:[#allocation23_spill]]  ;;  %s1599_s28 = smov %s1137_s29 }
 0x2e2   : > { %s1592_s11 = sld [smem:[#allocation19_spill]]  ;;  %s1601_s30 = smov %s1145_s8 }
 0x2e3   : > { %s1593_s13 = sld [smem:[#allocation20_spill]]  ;;  %s1597_s25 = smov %s1587_s0 }
 0x2e4   : > { %s1594_s4 = sld [smem:[#allocation21_spill]]  ;;  %s1604_s10 = smov %s1161_s12 }
 0x2e5   : > { %s1600_s29 = smov %s1589_s22 }
 0x2e6   : > { %s1602_s8 = smov %s1590_s18  ;;  %23 = sbr.rel (!%p1490_p5) target bundleno = 16 (0x10), region = 123 }
 0x2e7   : > { %s1603_s9 = smov %s1591_s17 }
 0x2e9   : > { %s1605_s12 = smov %s1593_s13 }
 0x2ea   : > { %s1606_s13 = smov %s1594_s4 }
 0x2eb   :  { %602 = vsyncpa [#allocation4], 1 }
 0x2ec   :  { %604 = vsyncpa [#allocation4 + $0x1], 1 }
 0x2ed   :  { %605 = vsyncpa [#allocation7], 1 }
 0x2ee   :  { %606 = vsyncpa [#allocation5], 1 }
 0x2ef   :  { %608 = vsyncpa [#allocation5 + $0x1], 1 }

</bundles_post_ra>
